<compile_context>
chip_gen: v7x
topology: tpu7x:2x2x1
jax: 0.10.0
libtpu: 0.0.40
codegen_flags: <defaults>
</compile_context>

<pallas_src>
import jax
import jax.numpy as jnp
from jax.experimental import pallas as pl
from jax.experimental.pallas import tpu as pltpu


def _round_up(n, m):
    return ((n + m - 1) // m) * m


def _vmem_capacity_bytes():
    try:
        return int(pltpu.get_tpu_info().vmem_capacity_bytes)
    except Exception:
        return 64 * 1024 * 1024  # conservative: v7x per-TC VMEM


# ----------------------------------------------------------------------------
# Kernel
# ----------------------------------------------------------------------------
def linear_sigmoid_kernel(x_ref, w_ref, b_ref, o_ref):
    # x_ref: (tm, In)   w_ref: (In, Out_p)   b_ref: (1, Out_p)   o_ref: (tm, Out_p)
    z = jnp.dot(x_ref[...], w_ref[...], preferred_element_type=jnp.float32)
    z = z + b_ref[...]                      # (1, Out_p) broadcasts; f32
    # sigmoid(z) = 0.5 * tanh(0.5 * z) + 0.5 : single EUP push, exact.
    o_ref[...] = (0.5 * jnp.tanh(0.5 * z) + 0.5).astype(o_ref.dtype)


# ----------------------------------------------------------------------------
# One-time (load-time) parameter preparation — NOT in the per-call path.
# ----------------------------------------------------------------------------
def prepare_probe_params(weight, bias, *, compute_dtype=jnp.float32):
    """weight: (Out, In) torch layout; bias: (Out,).

    Returns (w_t, b_p, out_size):
      w_t: (In, Out_p) weight, transposed + zero-padded to Out_p = ceil128(Out)
      b_p: (1, Out_p)  bias, zero-padded (kept f32)
    Zero padding keeps the math exact; padded output lanes are sliced off.
    """
    Out, In = weight.shape
    Out_p = _round_up(Out, 128)
    w_t = jnp.pad(weight.T.astype(compute_dtype), ((0, 0), (0, Out_p - Out)))
    b_p = jnp.pad(bias.astype(jnp.float32), (0, Out_p - Out)).reshape(1, Out_p)
    return w_t, b_p, Out


# ----------------------------------------------------------------------------
# Forward
# ----------------------------------------------------------------------------
def linear_probe_forward(x, w_t, b_p, out_size, *, tm_max=512):
    """x: (B, In); w_t: (In, Out_p) prepared weight; b_p: (1, Out_p) bias."""
    B, In = x.shape
    In_w, Out_p = w_t.shape
    assert In_w == In, "prepared weight In dim mismatch"

    # Cast x to the compute dtype of the prepared weight (no-op for f32).
    x = x.astype(w_t.dtype)
    xb = jnp.dtype(x.dtype).itemsize
    wb = jnp.dtype(w_t.dtype).itemsize

    # --- batch tile selection ------------------------------------------------
    if B <= 8:
        tm = B                              # block == full dim (ragged-8 OK)
    else:
        B8 = _round_up(B, 8)
        tm = min(tm_max, B8)
        # Keep >= 2 grid steps so v7x's 2 TensorCores both get work and the
        # DMA/compute pipeline has something to overlap with.
        tm = min(tm, max(8, _round_up(-(-B8 // 2), 8)))

    # --- VMEM budget (chip-aware) --------------------------------------------
    vmem_cap = _vmem_capacity_bytes()
    vmem_budget = min(vmem_cap * 3 // 4, 100 * 1024 * 1024)

    # Conservative estimate (counts 2 buffers even for the resident W/bias).
    param_bytes = 2 * (In * Out_p * wb + Out_p * 4)

    def _vmem_need(t):
        return 2 * t * In * xb + 2 * t * Out_p * 4 + param_bytes

    while tm > 8 and _vmem_need(tm) > vmem_budget:
        tm -= 8

    num_blocks = pl.cdiv(B, tm)

    # --- pallas_call ----------------------------------------------------------
    def _build_call(single_buffer_params):
        # Grid-invariant W/bias: single-buffer them to halve their VMEM
        # footprint (main lever under v7x's 64 MiB VMEM).
        w_kw = dict(pipeline_mode=pl.Buffered(1)) if single_buffer_params else {}
        return pl.pallas_call(
            linear_sigmoid_kernel,
            out_shape=jax.ShapeDtypeStruct((B, Out_p), jnp.float32),
            grid_spec=pltpu.PrefetchScalarGridSpec(
                num_scalar_prefetch=0,
                grid=(num_blocks,),
                in_specs=[
                    pl.BlockSpec((tm, In), lambda i: (i, 0)),          # x: batch-tiled
                    pl.BlockSpec((In, Out_p), lambda i: (0, 0), **w_kw),  # W resident
                    pl.BlockSpec((1, Out_p), lambda i: (0, 0), **w_kw),   # b resident
                ],
                out_specs=pl.BlockSpec((tm, Out_p), lambda i: (i, 0)),
            ),
            compiler_params=pltpu.CompilerParams(
                dimension_semantics=("parallel",),   # shard batch tiles across TCs
                vmem_limit_bytes=int(vmem_budget),
            ),
        )

    try:
        out_p = _build_call(True)(x, w_t, b_p)
    except Exception:
        # Fallback if this jax build rejects pipeline_mode=pl.Buffered(1).
        out_p = _build_call(False)(x, w_t, b_p)

    return out_p[:, :out_size]


# ----------------------------------------------------------------------------
# Self-test
# ----------------------------------------------------------------------------
if __name__ == "__main__":
    key = jax.random.PRNGKey(0)
    k_x, k_w, k_b = jax.random.split(key, 3)

    batch, input_size, output_size = 8, 32, 16

    x = jax.random.normal(k_x, (batch, input_size), dtype=jnp.float32)
    # Deterministic init mimicking torch.nn.Linear's U(-1/sqrt(in), 1/sqrt(in)).
    bound = 1.0 / (input_size ** 0.5)
    weight = jax.random.uniform(
        k_w, (output_size, input_size), dtype=jnp.float32, minval=-bound, maxval=bound
    )
    bias = jax.random.uniform(
        k_b, (output_size,), dtype=jnp.float32, minval=-bound, maxval=bound
    )

    # One-time param prep (transpose + pad), then the per-call forward.
    w_t, b_p, out_size = prepare_probe_params(weight, bias)
    out = linear_probe_forward(x, w_t, b_p, out_size)
    out = jax.block_until_ready(out)

    # Reference check in plain JAX (exact sigmoid -> tight tolerance).
    ref = jax.nn.sigmoid(x @ weight.T + bias)
    assert out.shape == (batch, output_size)
    assert jnp.allclose(out, ref, atol=1e-5, rtol=1e-5)

    print("KERNEL_OK")
</pallas_src>

<mosaic_0001>
module attributes {stable_mosaic.version = 11 : i64} {
  func.func @linear_sigmoid_kernel(%arg0: i32, %arg1: memref<8x32xf32, #tpu.memory_space<vmem>>, %arg2: memref<32x128xf32, #tpu.memory_space<vmem>>, %arg3: memref<1x128xf32, #tpu.memory_space<vmem>>, %arg4: memref<8x128xf32, #tpu.memory_space<vmem>>) attributes {dimension_semantics = [#tpu.dimension_semantics<parallel>], iteration_bounds = array<i64: 1>, scalar_prefetch = 0 : i64, scratch_operands = 0 : i64, tpu.core_type = #tpu.core_type<tc>, window_params = [{transform_indices = @transform_0, window_bounds = array<i64: 8, 32>}, {pipeline_mode = #tpu.pipeline_mode<synchronous>, transform_indices = @transform_1, window_bounds = array<i64: 32, 128>}, {pipeline_mode = #tpu.pipeline_mode<synchronous>, transform_indices = @transform_2, window_bounds = array<i64: 1, 128>}, {transform_indices = @transform_3, window_bounds = array<i64: 8, 128>}]} {
    %c0 = arith.constant 0 : index
    %c0_0 = arith.constant 0 : index
    %0 = vector.load %arg1[%c0, %c0_0] : memref<8x32xf32, #tpu.memory_space<vmem>>, vector<8x32xf32>
    %c0_1 = arith.constant 0 : index
    %c0_2 = arith.constant 0 : index
    %1 = vector.load %arg2[%c0_1, %c0_2] : memref<32x128xf32, #tpu.memory_space<vmem>>, vector<32x128xf32>
    %cst = arith.constant dense<0.000000e+00> : vector<8x128xf32>
    %2 = tpu.matmul %0, %1, %cst {dimension_numbers = #tpu.dot_dimension_numbers<[1], [0], [0], [1], [0, 0, 1, 1], [], []>} : vector<8x32xf32>, vector<32x128xf32>, vector<8x128xf32> -> vector<8x128xf32>
    %c0_3 = arith.constant 0 : index
    %c0_4 = arith.constant 0 : index
    %3 = vector.load %arg3[%c0_3, %c0_4] : memref<1x128xf32, #tpu.memory_space<vmem>>, vector<1x128xf32>
    %4 = vector.broadcast %3 : vector<1x128xf32> to vector<8x128xf32>
    %5 = arith.addf %2, %4 : vector<8x128xf32>
    %cst_5 = arith.constant 5.000000e-01 : f32
    %6 = vector.broadcast %cst_5 : f32 to vector<8x128xf32>
    %7 = arith.mulf %6, %5 : vector<8x128xf32>
    %8 = math.tanh %7 : vector<8x128xf32>
    %cst_6 = arith.constant 5.000000e-01 : f32
    %9 = vector.broadcast %cst_6 : f32 to vector<8x128xf32>
    %10 = arith.mulf %9, %8 : vector<8x128xf32>
    %cst_7 = arith.constant 5.000000e-01 : f32
    %11 = vector.broadcast %cst_7 : f32 to vector<8x128xf32>
    %12 = arith.addf %10, %11 : vector<8x128xf32>
    %c0_8 = arith.constant 0 : index
    %c0_9 = arith.constant 0 : index
    %13 = vector.load %arg4[%c0_8, %c0_9] : memref<8x128xf32, #tpu.memory_space<vmem>>, vector<8x128xf32>
    tpu.vector_store %arg4[%c0_8, %c0_9], %12 {strides = array<i32>} : memref<8x128xf32, #tpu.memory_space<vmem>>, vector<8x128xf32>,
    return
  }
  func.func @transform_0(%arg0: i32) -> (i32, i32) {
    %c0_i32 = arith.constant 0 : i32
    %c0_i32_0 = arith.constant 0 : i32
    return %arg0, %c0_i32 : i32, i32
  }
  func.func @transform_1(%arg0: i32) -> (i32, i32) {
    %c0_i32 = arith.constant 0 : i32
    %c0_i32_0 = arith.constant 0 : i32
    %c0_i32_1 = arith.constant 0 : i32
    return %c0_i32, %c0_i32_0 : i32, i32
  }
  func.func @transform_2(%arg0: i32) -> (i32, i32) {
    %c0_i32 = arith.constant 0 : i32
    %c0_i32_0 = arith.constant 0 : i32
    %c0_i32_1 = arith.constant 0 : i32
    return %c0_i32, %c0_i32_0 : i32, i32
  }
  func.func @transform_3(%arg0: i32) -> (i32, i32) {
    %c0_i32 = arith.constant 0 : i32
    %c0_i32_0 = arith.constant 0 : i32
    return %arg0, %c0_i32 : i32, i32
  }
}

module attributes {stable_mosaic.version = 11 : i64} {
  func.func @linear_sigmoid_kernel(%arg0: i32, %arg1: memref<8x32xf32, #tpu.memory_space<vmem>>, %arg2: memref<32x128xf32, #tpu.memory_space<vmem>>, %arg3: memref<1x128xf32, #tpu.memory_space<vmem>>, %arg4: memref<8x128xf32, #tpu.memory_space<vmem>>) attributes {dimension_semantics = [#tpu.dimension_semantics<parallel>], iteration_bounds = array<i64: 1>, scalar_prefetch = 0 : i64, scratch_operands = 0 : i64, tpu.core_type = #tpu.core_type<tc>, window_params = [{transform_indices = @transform_0, window_bounds = array<i64: 8, 32>}, {pipeline_mode = #tpu.pipeline_mode<synchronous>, transform_indices = @transform_1, window_bounds = array<i64: 32, 128>}, {pipeline_mode = #tpu.pipeline_mode<synchronous>, transform_indices = @transform_2, window_bounds = array<i64: 1, 128>}, {transform_indices = @transform_3, window_bounds = array<i64: 8, 128>}]} {
    %c0 = arith.constant 0 : index
    %c0_0 = arith.constant 0 : index
    %0 = vector.load %arg1[%c0, %c0_0] : memref<8x32xf32, #tpu.memory_space<vmem>>, vector<8x32xf32>
    %c0_1 = arith.constant 0 : index
    %c0_2 = arith.constant 0 : index
    %1 = vector.load %arg2[%c0_1, %c0_2] : memref<32x128xf32, #tpu.memory_space<vmem>>, vector<32x128xf32>
    %cst = arith.constant dense<0.000000e+00> : vector<8x128xf32>
    %2 = tpu.matmul %0, %1, %cst {dimension_numbers = #tpu.dot_dimension_numbers<[1], [0], [0], [1], [0, 0, 1, 1], [], []>} : vector<8x32xf32>, vector<32x128xf32>, vector<8x128xf32> -> vector<8x128xf32>
    %c0_3 = arith.constant 0 : index
    %c0_4 = arith.constant 0 : index
    %3 = vector.load %arg3[%c0_3, %c0_4] : memref<1x128xf32, #tpu.memory_space<vmem>>, vector<1x128xf32>
    %4 = vector.broadcast %3 : vector<1x128xf32> to vector<8x128xf32>
    %5 = arith.addf %2, %4 : vector<8x128xf32>
    %cst_5 = arith.constant 5.000000e-01 : f32
    %6 = vector.broadcast %cst_5 : f32 to vector<8x128xf32>
    %7 = arith.mulf %6, %5 : vector<8x128xf32>
    %8 = math.tanh %7 : vector<8x128xf32>
    %cst_6 = arith.constant 5.000000e-01 : f32
    %9 = vector.broadcast %cst_6 : f32 to vector<8x128xf32>
    %10 = arith.mulf %9, %8 : vector<8x128xf32>
    %cst_7 = arith.constant 5.000000e-01 : f32
    %11 = vector.broadcast %cst_7 : f32 to vector<8x128xf32>
    %12 = arith.addf %10, %11 : vector<8x128xf32>
    %c0_8 = arith.constant 0 : index
    %c0_9 = arith.constant 0 : index
    %13 = vector.load %arg4[%c0_8, %c0_9] : memref<8x128xf32, #tpu.memory_space<vmem>>, vector<8x128xf32>
    tpu.vector_store %arg4[%c0_8, %c0_9], %12 {strides = array<i32>} : memref<8x128xf32, #tpu.memory_space<vmem>>, vector<8x128xf32>,
    return
  }
  func.func @transform_0(%arg0: i32) -> (i32, i32) {
    %c0_i32 = arith.constant 0 : i32
    %c0_i32_0 = arith.constant 0 : i32
    return %arg0, %c0_i32 : i32, i32
  }
  func.func @transform_1(%arg0: i32) -> (i32, i32) {
    %c0_i32 = arith.constant 0 : i32
    %c0_i32_0 = arith.constant 0 : i32
    %c0_i32_1 = arith.constant 0 : i32
    return %c0_i32, %c0_i32_0 : i32, i32
  }
  func.func @transform_2(%arg0: i32) -> (i32, i32) {
    %c0_i32 = arith.constant 0 : i32
    %c0_i32_0 = arith.constant 0 : i32
    %c0_i32_1 = arith.constant 0 : i32
    return %c0_i32, %c0_i32_0 : i32, i32
  }
  func.func @transform_3(%arg0: i32) -> (i32, i32) {
    %c0_i32 = arith.constant 0 : i32
    %c0_i32_0 = arith.constant 0 : i32
    return %arg0, %c0_i32 : i32, i32
  }
}

</mosaic_0001>

<bundles_post_ra>
// kernel: tpu_custom_call.1
= control target key start
LH: loop header
LB: loop body
LE: loop exit
PB: predicated region body
PF: predicated region fallthrough
CT: control target
= control target key end

     0   :  { %8 = vsyncpa [#allocation3], 0  ;;  %s328_s0 = inlined_call_operand.hbm [shape: f32[8,32], index: 0, kind: input, shape index: {}]   ;;  %s329_s1 = inlined_call_operand.hbm [shape: f32[32,128], index: 1, kind: input, shape index: {}]   ;;  %s330_s2 = inlined_call_operand.vmem [shape: f32[1,128], index: 2, kind: input, shape index: {}]   ;;  %s331_s3 = inlined_call_operand.hbm [shape: f32[8,128], index: 3, kind: output, shape index: {}]  }
   0x1   :  { %9 = vsyncpa [#allocation6], 0 }
   0x2   :  { %10 = vsyncpa [#allocation4], 0  ;;  %s254_s12 = smov [#allocation2]   ;;  %s255_s14 = smov [#allocation5]  }
   0x3   :  { %s17_s13 = sshll.u32 %s254_s12, 4  ;;  %s26_s15 = sshll.u32 %s255_s14, 4  ;;  %s18_s13 = int_to_ptr.vmem [resolvable:$true] %s17_s13  ;;  %s282_s15 = int_to_ptr.vmem [resolvable:$true] %s26_s15 }
   0x4   :  { %s182_s18 = scalar_lea.hbm %s328_s0, 128 }
   0x5   :  { %p183_p0 = scmp.ne.s32.totalorder %s328_s0, %s182_s18  ;;  %p186_p1 = scmp.lt.u32.totalorder %s182_s18, %s328_s0 }
   0x7   :  { %p188_p2 = pnand %p186_p1, %p183_p0 }
   0x9   :  { %191 = shalt.err (!%p188_p2)
}
   0xa   :  { %s192_s23 = scalar_lea.vmem %s18_s13, 128  ;;  %p197_p4 = scmp.lt.s32.totalorder %s18_s13, %s18_s13 }
   0xb   :  { %p193_p3 = scmp.ne.s32.totalorder %s18_s13, %s192_s23  ;;  %p198_p5 = scmp.lt.s32.totalorder %s192_s23, %s192_s23 }
   0xd   :  { %p199_p6 = por %p198_p5, %p197_p4 }
   0xf   :  { %p200_p7 = pnand %p199_p6, %p193_p3 }
  0x11   :  { %203 = shalt.err (!%p200_p7)
}
  0x12   :  { %20 = dma.hbm_to_vmem [thread:$0]  %s328_s0, 128, %s18_s13, [#allocation3]  }
  0x13   :  { %s204_s28 = scalar_lea.hbm %s329_s1, 512 }
  0x14   :  { %p205_p8 = scmp.ne.s32.totalorder %s329_s1, %s204_s28  ;;  %p208_p9 = scmp.lt.u32.totalorder %s204_s28, %s329_s1 }
  0x16   :  { %p210_p10 = pnand %p208_p9, %p205_p8 }
  0x18   :  { %213 = shalt.err (!%p210_p10)
}
  0x19   :  { %s214_s6 = scalar_lea.vmem %s282_s15, 512  ;;  %p219_p12 = scmp.lt.s32.totalorder %s282_s15, %s282_s15 }
  0x1a   :  { %p215_p11 = scmp.ne.s32.totalorder %s282_s15, %s214_s6  ;;  %p220_p13 = scmp.lt.s32.totalorder %s214_s6, %s214_s6 }
  0x1c   :  { %p221_p0 = por %p220_p13, %p219_p12 }
  0x1e   :  { %p222_p1 = pnand %p221_p0, %p215_p11 }
  0x20   :  { %225 = shalt.err (!%p222_p1)
}
  0x21   :  { %s256_s0 = smov 128   ;;  %s257_s7 = smov 8  }
  0x22   :  { %32 = dma.hbm_to_vmem [thread:$0]  %s329_s1, 512, %s282_s15, [#allocation6], %s256_s0, %s256_s0, %s257_s7  }
  0x23   :  { %248 = dma.done.wait [#allocation3], 128  }
  0x24   :  { %249 = vsyncadd [#allocation3], 4294967168 }
  0x25   :  { %250 = dma.done.wait [#allocation6], 512  }
  0x26   :  { %251 = vsyncadd [#allocation6], 4294966784  ;;  %v258_v0 = vmov 0.0|0.0   ;;  %vm259_vm0 = vmmov 0   ;;  %v260_v1 = vmov 0.0   ;;  %v42_v2 = vld [vmem:[#allocation5] sm:$0xff] }
  0x27   :  { %166 = vmatprep.subr.bf16.mxu0 %v258_v0  ;;  %163 = vmatprep.mubr.msk.f32.mxu0 %vm259_vm0, %v260_v1  ;;  %v43_v3 = vld [vmem:[#allocation5 + $0x8] sm:$0xff]  ;;  %v44_v4 = vld [vmem:[#allocation5 + $0x10] sm:$0xff]  ;;  %v45_v6 = vld [vmem:[#allocation5 + $0x18] sm:$0xff]  ;;  %vm53_vm1 = vcmask 261120   ;;  %s261_s11 = smov [#allocation7]  }
  0x28   :  { %v167_v5 = vpack.c.bf16 %v43_v3, %v42_v2  ;;  %v170_v7 = vpack.c.bf16 %v45_v6, %v44_v4  ;;  %v41_v8 = vld [vmem:[#allocation2] sm:$0xff]  ;;  %s138_s12 = sshll.u32 %s261_s11, 4  ;;  %s139_s12 = int_to_ptr.vmem [resolvable:$true] %s138_s12 }
  0x29   :  { %v148_v9 = vld [vmem:[%s330_s2] ss:$0 sm:$0xff]  ;;  %s226_s13 = scalar_lea.vmem %s139_s12, 128  ;;  %p231_p3 = scmp.lt.s32.totalorder %s139_s12, %s139_s12 }
  0x2a   :  { %168 = vmatpush3.bf16.msra.mxu0 %v167_v5  ;;  %p227_p2 = scmp.ne.s32.totalorder %s139_s12, %s226_s13  ;;  %p232_p4 = scmp.lt.s32.totalorder %s226_s13, %s226_s13 }
  0x2b   :  { %169 = vmatprep.subr.bf16.mxu0 %v258_v0 }
  0x2c   :  { %p233_p5 = por %p232_p4, %p231_p3 }
  0x2e   :  { %171 = vmatpush3.bf16.msra.mxu0 %v170_v7  ;;  %p234_p6 = pnand %p233_p5, %p227_p2 }
  0x31   :  { %164 = vmatmul.mubr.msk.f32.vlgmr.msra.gmra.mrb[0].mxu0 %vm53_vm1, %v41_v8 }
 0x104   :  { %v123_v10 = vpop.f32.mrb[0].mxu0 }
 0x105   :  { %v124_v11 = vadd.f32 %v148_v9, %v123_v10  ;;  %v165_v12 = vpop.f32.mrb[1].mxu0 }
 0x107   :  { %v127_v13 = vmul.f32 0.5, %v124_v11 }
 0x109   :  { %180 = vtanh.f32 %v127_v13 }
 0x113   :  { %v181_v14 = vpop.eup %180 }
 0x114   :  { %v129_v15 = vmul.f32 0.5, %v181_v14 }
 0x116   :  { %v130_v16 = vadd.f32 0.5, %v129_v15 }
 0x118   :  { %131 = vst [vmem:[#allocation7] sm:$0xff] %v130_v16 }
 0x119   :  { %237 = shalt.err (!%p234_p6)
}
 0x11a   :  { %s238_s15 = scalar_lea.hbm %s331_s3, 128 }
 0x11b   :  { %p239_p7 = scmp.ne.s32.totalorder %s331_s3, %s238_s15  ;;  %p242_p8 = scmp.lt.u32.totalorder %s238_s15, %s331_s3 }
 0x11d   :  { %p244_p9 = pnand %p242_p8, %p239_p7 }
 0x11f   :  { %247 = shalt.err (!%p244_p9)
}
 0x120   :  { %141 = dma.vmem_to_hbm [thread:$0]  %s139_s12, 128, %s331_s3, [#allocation4]  }
 0x121   :  { %252 = dma.done.wait [#allocation4], 128  }
 0x122   :  { %253 = vsyncadd [#allocation4], 4294967168 }
 0x123   :  { %145 = vsyncpa [#allocation3], 1 }
 0x124   :  { %146 = vsyncpa [#allocation6], 1 }
 0x125   :  { %147 = vsyncpa [#allocation4], 1 }

// kernel: tpu_custom_call.1
= control target key start
LH: loop header
LB: loop body
LE: loop exit
PB: predicated region body
PF: predicated region fallthrough
CT: control target
= control target key end

     0   :  { %8 = vsyncpa [#allocation3], 0  ;;  %s328_s0 = inlined_call_operand.hbm [shape: f32[8,32], index: 0, kind: input, shape index: {}]   ;;  %s329_s1 = inlined_call_operand.hbm [shape: f32[32,128], index: 1, kind: input, shape index: {}]   ;;  %s330_s2 = inlined_call_operand.vmem [shape: f32[1,128], index: 2, kind: input, shape index: {}]   ;;  %s331_s3 = inlined_call_operand.hbm [shape: f32[8,128], index: 3, kind: output, shape index: {}]  }
   0x1   :  { %9 = vsyncpa [#allocation6], 0 }
   0x2   :  { %10 = vsyncpa [#allocation4], 0  ;;  %s254_s12 = smov [#allocation2]   ;;  %s255_s14 = smov [#allocation5]  }
   0x3   :  { %s17_s13 = sshll.u32 %s254_s12, 4  ;;  %s26_s15 = sshll.u32 %s255_s14, 4  ;;  %s18_s13 = int_to_ptr.vmem [resolvable:$true] %s17_s13  ;;  %s282_s15 = int_to_ptr.vmem [resolvable:$true] %s26_s15 }
   0x4   :  { %s182_s18 = scalar_lea.hbm %s328_s0, 128 }
   0x5   :  { %p183_p0 = scmp.ne.s32.totalorder %s328_s0, %s182_s18  ;;  %p186_p1 = scmp.lt.u32.totalorder %s182_s18, %s328_s0 }
   0x7   :  { %p188_p2 = pnand %p186_p1, %p183_p0 }
   0x9   :  { %191 = shalt.err (!%p188_p2)
}
   0xa   :  { %s192_s23 = scalar_lea.vmem %s18_s13, 128  ;;  %p197_p4 = scmp.lt.s32.totalorder %s18_s13, %s18_s13 }
   0xb   :  { %p193_p3 = scmp.ne.s32.totalorder %s18_s13, %s192_s23  ;;  %p198_p5 = scmp.lt.s32.totalorder %s192_s23, %s192_s23 }
   0xd   :  { %p199_p6 = por %p198_p5, %p197_p4 }
   0xf   :  { %p200_p7 = pnand %p199_p6, %p193_p3 }
  0x11   :  { %203 = shalt.err (!%p200_p7)
}
  0x12   :  { %20 = dma.hbm_to_vmem [thread:$0]  %s328_s0, 128, %s18_s13, [#allocation3]  }
  0x13   :  { %s204_s28 = scalar_lea.hbm %s329_s1, 512 }
  0x14   :  { %p205_p8 = scmp.ne.s32.totalorder %s329_s1, %s204_s28  ;;  %p208_p9 = scmp.lt.u32.totalorder %s204_s28, %s329_s1 }
  0x16   :  { %p210_p10 = pnand %p208_p9, %p205_p8 }
  0x18   :  { %213 = shalt.err (!%p210_p10)
}
  0x19   :  { %s214_s6 = scalar_lea.vmem %s282_s15, 512  ;;  %p219_p12 = scmp.lt.s32.totalorder %s282_s15, %s282_s15 }
  0x1a   :  { %p215_p11 = scmp.ne.s32.totalorder %s282_s15, %s214_s6  ;;  %p220_p13 = scmp.lt.s32.totalorder %s214_s6, %s214_s6 }
  0x1c   :  { %p221_p0 = por %p220_p13, %p219_p12 }
  0x1e   :  { %p222_p1 = pnand %p221_p0, %p215_p11 }
  0x20   :  { %225 = shalt.err (!%p222_p1)
}
  0x21   :  { %s256_s0 = smov 128   ;;  %s257_s7 = smov 8  }
  0x22   :  { %32 = dma.hbm_to_vmem [thread:$0]  %s329_s1, 512, %s282_s15, [#allocation6], %s256_s0, %s256_s0, %s257_s7  }
  0x23   :  { %248 = dma.done.wait [#allocation3], 128  }
  0x24   :  { %249 = vsyncadd [#allocation3], 4294967168 }
  0x25   :  { %250 = dma.done.wait [#allocation6], 512  }
  0x26   :  { %251 = vsyncadd [#allocation6], 4294966784  ;;  %v258_v0 = vmov 0.0|0.0   ;;  %vm259_vm0 = vmmov 0   ;;  %v260_v1 = vmov 0.0   ;;  %v42_v2 = vld [vmem:[#allocation5] sm:$0xff] }
  0x27   :  { %166 = vmatprep.subr.bf16.mxu0 %v258_v0  ;;  %163 = vmatprep.mubr.msk.f32.mxu0 %vm259_vm0, %v260_v1  ;;  %v43_v3 = vld [vmem:[#allocation5 + $0x8] sm:$0xff]  ;;  %v44_v4 = vld [vmem:[#allocation5 + $0x10] sm:$0xff]  ;;  %v45_v6 = vld [vmem:[#allocation5 + $0x18] sm:$0xff]  ;;  %vm53_vm1 = vcmask 261120   ;;  %s261_s11 = smov [#allocation7]  }
  0x28   :  { %v167_v5 = vpack.c.bf16 %v43_v3, %v42_v2  ;;  %v170_v7 = vpack.c.bf16 %v45_v6, %v44_v4  ;;  %v41_v8 = vld [vmem:[#allocation2] sm:$0xff]  ;;  %s138_s12 = sshll.u32 %s261_s11, 4  ;;  %s139_s12 = int_to_ptr.vmem [resolvable:$true] %s138_s12 }
  0x29   :  { %v148_v9 = vld [vmem:[%s330_s2] ss:$0 sm:$0xff]  ;;  %s226_s13 = scalar_lea.vmem %s139_s12, 128  ;;  %p231_p3 = scmp.lt.s32.totalorder %s139_s12, %s139_s12 }
  0x2a   :  { %168 = vmatpush3.bf16.msra.mxu0 %v167_v5  ;;  %p227_p2 = scmp.ne.s32.totalorder %s139_s12, %s226_s13  ;;  %p232_p4 = scmp.lt.s32.totalorder %s226_s13, %s226_s13 }
  0x2b   :  { %169 = vmatprep.subr.bf16.mxu0 %v258_v0 }
  0x2c   :  { %p233_p5 = por %p232_p4, %p231_p3 }
  0x2e   :  { %171 = vmatpush3.bf16.msra.mxu0 %v170_v7  ;;  %p234_p6 = pnand %p233_p5, %p227_p2 }
  0x31   :  { %164 = vmatmul.mubr.msk.f32.vlgmr.msra.gmra.mrb[0].mxu0 %vm53_vm1, %v41_v8 }
 0x104   :  { %v123_v10 = vpop.f32.mrb[0].mxu0 }
 0x105   :  { %v124_v11 = vadd.f32 %v148_v9, %v123_v10  ;;  %v165_v12 = vpop.f32.mrb[1].mxu0 }
 0x107   :  { %v127_v13 = vmul.f32 0.5, %v124_v11 }
 0x109   :  { %180 = vtanh.f32 %v127_v13 }
 0x113   :  { %v181_v14 = vpop.eup %180 }
 0x114   :  { %v129_v15 = vmul.f32 0.5, %v181_v14 }
 0x116   :  { %v130_v16 = vadd.f32 0.5, %v129_v15 }
 0x118   :  { %131 = vst [vmem:[#allocation7] sm:$0xff] %v130_v16 }
 0x119   :  { %237 = shalt.err (!%p234_p6)
}
 0x11a   :  { %s238_s15 = scalar_lea.hbm %s331_s3, 128 }
 0x11b   :  { %p239_p7 = scmp.ne.s32.totalorder %s331_s3, %s238_s15  ;;  %p242_p8 = scmp.lt.u32.totalorder %s238_s15, %s331_s3 }
 0x11d   :  { %p244_p9 = pnand %p242_p8, %p239_p7 }
 0x11f   :  { %247 = shalt.err (!%p244_p9)
}
 0x120   :  { %141 = dma.vmem_to_hbm [thread:$0]  %s139_s12, 128, %s331_s3, [#allocation4]  }
 0x121   :  { %252 = dma.done.wait [#allocation4], 128  }
 0x122   :  { %253 = vsyncadd [#allocation4], 4294967168 }
 0x123   :  { %145 = vsyncpa [#allocation3], 1 }
 0x124   :  { %146 = vsyncpa [#allocation6], 1 }
 0x125   :  { %147 = vsyncpa [#allocation4], 1 }

</bundles_post_ra>
